<compile_context>
chip_gen: v7x
topology: tpu7x:2x2x1
jax: 0.10.0
libtpu: 0.0.40
codegen_flags: <defaults>
</compile_context>

<pallas_src>
import functools
import math

import jax
import jax.numpy as jnp
from jax.experimental import pallas as pl
from jax.experimental.pallas import tpu as pltpu


def _round_up(x, m):
    return (x + m - 1) // m * m


def _fft_l1_kernel(p_ref, t_ref, cwsw_ref, mret_ref, mimt_ref, out_ref, *,
                   compute_dtype):
    # p_ref / t_ref : (TB, H, W) f32 image-plane blocks
    # cwsw_ref      : (W, 2*Wfp)  [cos | -sin]  fused W-direction real DFT
    # mret_ref      : (H, 2H)     [ch ; dh]^T   (H-direction, multiplies yr^T)
    # mimt_ref      : (H, 2H)     [-dh ; ch]^T  (H-direction, multiplies yi^T)
    # out_ref       : (1, 8, 2H)  per-step partial L1 sums
    TB, H, W = p_ref.shape
    Wfp = cwsw_ref.shape[1] // 2

    # FFT linearity: transform the difference once.
    d = p_ref[...] - t_ref[...]                           # (TB, H, W) f32
    d2 = d.reshape(TB * H, W).astype(compute_dtype)       # merge planes -> big M

    # W-direction rfft: single fused matmul producing [yr | yi] along lanes.
    y = jnp.dot(d2, cwsw_ref[...],
                preferred_element_type=jnp.float32)       # (TB*H, 2*Wfp) f32
    y3 = y.reshape(TB, H, 2 * Wfp)
    yr = y3[:, :, :Wfp]                                   # lane-aligned slices
    yi = y3[:, :, Wfp:]

    # Corner turn: per-plane (H, Wfp) -> (Wfp, H) so H becomes the contraction
    # axis while the big data axis stays on M (XLU work, off the MXU path).
    yrT = jnp.swapaxes(yr, 1, 2).reshape(TB * Wfp, H).astype(compute_dtype)
    yiT = jnp.swapaxes(yi, 1, 2).reshape(TB * Wfp, H).astype(compute_dtype)

    # H-direction complex DFT with unbatched constants on the RHS:
    #   z^T = yr^T @ [ch;dh]^T + yi^T @ [-dh;ch]^T        -> (TB*Wfp, 2H) f32
    z = (jnp.dot(yrT, mret_ref[...], preferred_element_type=jnp.float32)
         + jnp.dot(yiT, mimt_ref[...], preferred_element_type=jnp.float32))

    # Partial L1 sum reduced only along the leading sublane-group axis: vreg
    # adds on the VPU, no cross-lane reduction; zero-padded planes/columns
    # contribute exactly 0.  (TB*Wfp is a multiple of 128, hence of 8.)
    part = jnp.sum(jnp.abs(z).reshape(TB * Wfp // 8, 8, 2 * H), axis=0)
    out_ref[...] = part.reshape(1, 8, 2 * H)


def _dft_mats(L, K):
    # cos / -sin DFT matrices; angles from (n*k) mod L keep precision at big L.
    n = jnp.arange(L, dtype=jnp.int32)[:, None]
    k = jnp.arange(K, dtype=jnp.int32)[None, :]
    nk = (n * k) % L
    ang = (2.0 * math.pi / L) * nk.astype(jnp.float32)
    return jnp.cos(ang), -jnp.sin(ang)


@functools.partial(jax.jit, static_argnames=("loss_weight", "compute_dtype"))
def fft_loss(pred, target, loss_weight=1.0, compute_dtype=jnp.bfloat16):
    """Pallas TPU implementation of basicsr FFTLoss (reduction='mean')."""
    assert pred.shape == target.shape
    B, C, H, W = pred.shape
    Wf = W // 2 + 1
    Wfp = _round_up(Wf, 128)          # lane-dense rfft width
    N = B * C

    # Plane batching: target ~512 MXU rows per step, but keep G >= 2 whenever
    # N >= 2 (input DMA/compute pipelining + v7x 2-TensorCore parallel split).
    if N <= 1:
        TB = 1
    else:
        TB = max(1, min(512 // max(H, 1), N // 2))
    N_pad = _round_up(N, TB)
    G = N_pad // TB

    p = pred.reshape(N, H, W).astype(jnp.float32)
    t = target.reshape(N, H, W).astype(jnp.float32)
    if N_pad != N:                    # zero planes -> zero diff -> zero L1
        pad = ((0, N_pad - N), (0, 0), (0, 0))
        p = jnp.pad(p, pad)
        t = jnp.pad(t, pad)

    # DFT matrices (parameter setup, plain JAX, computed once).
    cw, sw = _dft_mats(W, Wf)         # (W, Wf): cos, -sin
    ch, dh = _dft_mats(H, H)          # (H, H):  cos, -sin

    # W-stage constant: zero-pad Wf -> Wfp and fuse [cos | -sin] along lanes.
    cw = jnp.pad(cw, ((0, 0), (0, Wfp - Wf)))
    sw = jnp.pad(sw, ((0, 0), (0, Wfp - Wf)))
    cwsw = jnp.concatenate([cw, sw], axis=1).astype(compute_dtype)  # (W, 2*Wfp)

    # H-stage constants, pre-transposed for data-on-M matmuls:
    #   z^T = yr^T @ m_reT + yi^T @ m_imT
    m_reT = jnp.concatenate([ch, dh], axis=0).T.astype(compute_dtype)   # (H, 2H)
    m_imT = jnp.concatenate([-dh, ch], axis=0).T.astype(compute_dtype)  # (H, 2H)

    partial = pl.pallas_call(
        functools.partial(_fft_l1_kernel, compute_dtype=compute_dtype),
        out_shape=jax.ShapeDtypeStruct((G, 8, 2 * H), jnp.float32),
        grid_spec=pltpu.PrefetchScalarGridSpec(
            num_scalar_prefetch=0,
            grid=(G,),
            in_specs=[
                pl.BlockSpec((TB, H, W), lambda i: (i, 0, 0)),      # pred block
                pl.BlockSpec((TB, H, W), lambda i: (i, 0, 0)),      # target block
                pl.BlockSpec((W, 2 * Wfp), lambda i: (0, 0)),       # [cos|-sin] W
                pl.BlockSpec((H, 2 * H), lambda i: (0, 0)),         # [ch;dh]^T
                pl.BlockSpec((H, 2 * H), lambda i: (0, 0)),         # [-dh;ch]^T
            ],
            out_specs=pl.BlockSpec((1, 8, 2 * H), lambda i: (i, 0, 0)),
        ),
        compiler_params=pltpu.CompilerParams(
            dimension_semantics=("parallel",)),
    )(p, t, cwsw, m_reT, m_imT)

    # 'mean' over stack([real, imag], -1): true (unpadded) element count.
    n_elems = N * H * Wf * 2
    return (loss_weight / n_elems) * jnp.sum(partial)


if __name__ == "__main__":
    key = jax.random.PRNGKey(0)
    k1, k2 = jax.random.split(key)
    B, C, H, W = 2, 4, 16, 16
    pred = jax.random.normal(k1, (B, C, H, W), dtype=jnp.float32)
    target = jax.random.normal(k2, (B, C, H, W), dtype=jnp.float32)

    loss = fft_loss(pred, target, loss_weight=1.0)
    loss = jax.block_until_ready(loss)

    # Reference check against jnp.fft.rfft2 (same semantics as torch.fft.rfft2).
    pf = jnp.fft.rfft2(pred)
    tf = jnp.fft.rfft2(target)
    ref = jnp.mean(
        jnp.abs(jnp.stack([pf.real, pf.imag], -1)
                - jnp.stack([tf.real, tf.imag], -1)))
    assert jnp.allclose(loss, ref, rtol=2e-2, atol=1e-3), (loss, ref)

    print("KERNEL_OK")
</pallas_src>

<mosaic_0001>
module attributes {stable_mosaic.version = 11 : i64} {
  func.func @_fft_l1_kernel(%arg0: i32, %arg1: memref<4x16x16xf32, #tpu.memory_space<vmem>>, %arg2: memref<4x16x16xf32, #tpu.memory_space<vmem>>, %arg3: memref<16x256xbf16, #tpu.memory_space<vmem>>, %arg4: memref<16x32xbf16, #tpu.memory_space<vmem>>, %arg5: memref<16x32xbf16, #tpu.memory_space<vmem>>, %arg6: memref<1x8x32xf32, #tpu.memory_space<vmem>>) attributes {dimension_semantics = [#tpu.dimension_semantics<parallel>], iteration_bounds = array<i64: 2>, scalar_prefetch = 0 : i64, scratch_operands = 0 : i64, tpu.core_type = #tpu.core_type<tc>, window_params = [{transform_indices = @transform_0, window_bounds = array<i64: 4, 16, 16>}, {transform_indices = @transform_1, window_bounds = array<i64: 4, 16, 16>}, {pipeline_mode = #tpu.pipeline_mode<synchronous>, transform_indices = @transform_2, window_bounds = array<i64: 16, 256>}, {pipeline_mode = #tpu.pipeline_mode<synchronous>, transform_indices = @transform_3, window_bounds = array<i64: 16, 32>}, {pipeline_mode = #tpu.pipeline_mode<synchronous>, transform_indices = @transform_4, window_bounds = array<i64: 16, 32>}, {transform_indices = @transform_5, window_bounds = array<i64: 1, 8, 32>}]} {
    %c0 = arith.constant 0 : index
    %c0_0 = arith.constant 0 : index
    %c0_1 = arith.constant 0 : index
    %0 = vector.load %arg1[%c0, %c0_0, %c0_1] : memref<4x16x16xf32, #tpu.memory_space<vmem>>, vector<4x16x16xf32>
    %c0_2 = arith.constant 0 : index
    %c0_3 = arith.constant 0 : index
    %c0_4 = arith.constant 0 : index
    %1 = vector.load %arg2[%c0_2, %c0_3, %c0_4] : memref<4x16x16xf32, #tpu.memory_space<vmem>>, vector<4x16x16xf32>
    %2 = arith.subf %0, %1 : vector<4x16x16xf32>
    %3 = vector.shape_cast %2 : vector<4x16x16xf32> to vector<64x16xf32>
    %4 = arith.truncf %3 : vector<64x16xf32> to vector<64x16xbf16>
    %c0_5 = arith.constant 0 : index
    %c0_6 = arith.constant 0 : index
    %5 = vector.load %arg3[%c0_5, %c0_6] : memref<16x256xbf16, #tpu.memory_space<vmem>>, vector<16x256xbf16>
    %cst = arith.constant dense<0.000000e+00> : vector<64x256xf32>
    %6 = tpu.matmul %4, %5, %cst {dimension_numbers = #tpu.dot_dimension_numbers<[1], [0], [0], [1], [0, 0, 1, 1], [], []>} : vector<64x16xbf16>, vector<16x256xbf16>, vector<64x256xf32> -> vector<64x256xf32>
    %7 = vector.shape_cast %6 : vector<64x256xf32> to vector<4x16x256xf32>
    %8 = vector.extract_strided_slice %7 {offsets = [0, 0, 0], sizes = [4, 16, 128], strides = [1, 1, 1]} : vector<4x16x256xf32> to vector<4x16x128xf32>
    %9 = vector.extract_strided_slice %7 {offsets = [0, 0, 128], sizes = [4, 16, 128], strides = [1, 1, 1]} : vector<4x16x256xf32> to vector<4x16x128xf32>
    %10 = tpu.transpose %8, [0, 2, 1] : vector<4x16x128xf32> -> vector<4x128x16xf32>
    %11 = vector.shape_cast %10 : vector<4x128x16xf32> to vector<512x16xf32>
    %12 = arith.truncf %11 : vector<512x16xf32> to vector<512x16xbf16>
    %13 = tpu.transpose %9, [0, 2, 1] : vector<4x16x128xf32> -> vector<4x128x16xf32>
    %14 = vector.shape_cast %13 : vector<4x128x16xf32> to vector<512x16xf32>
    %15 = arith.truncf %14 : vector<512x16xf32> to vector<512x16xbf16>
    %c0_7 = arith.constant 0 : index
    %c0_8 = arith.constant 0 : index
    %16 = vector.load %arg4[%c0_7, %c0_8] : memref<16x32xbf16, #tpu.memory_space<vmem>>, vector<16x32xbf16>
    %cst_9 = arith.constant dense<0.000000e+00> : vector<512x32xf32>
    %17 = tpu.matmul %12, %16, %cst_9 {dimension_numbers = #tpu.dot_dimension_numbers<[1], [0], [0], [1], [0, 0, 1, 1], [], []>} : vector<512x16xbf16>, vector<16x32xbf16>, vector<512x32xf32> -> vector<512x32xf32>
    %c0_10 = arith.constant 0 : index
    %c0_11 = arith.constant 0 : index
    %18 = vector.load %arg5[%c0_10, %c0_11] : memref<16x32xbf16, #tpu.memory_space<vmem>>, vector<16x32xbf16>
    %cst_12 = arith.constant dense<0.000000e+00> : vector<512x32xf32>
    %19 = tpu.matmul %15, %18, %cst_12 {dimension_numbers = #tpu.dot_dimension_numbers<[1], [0], [0], [1], [0, 0, 1, 1], [], []>} : vector<512x16xbf16>, vector<16x32xbf16>, vector<512x32xf32> -> vector<512x32xf32>
    %20 = arith.addf %17, %19 : vector<512x32xf32>
    %21 = math.absf %20 : vector<512x32xf32>
    %22 = vector.shape_cast %21 : vector<512x32xf32> to vector<64x8x32xf32>
    %cst_13 = arith.constant dense<0.000000e+00> : vector<8x32xf32>
    %23 = vector.multi_reduction <add>, %22, %cst_13 [0] : vector<64x8x32xf32> to vector<8x32xf32>
    %24 = vector.shape_cast %23 : vector<8x32xf32> to vector<1x8x32xf32>
    %c0_14 = arith.constant 0 : index
    %c0_15 = arith.constant 0 : index
    %c0_16 = arith.constant 0 : index
    %25 = vector.load %arg6[%c0_14, %c0_15, %c0_16] : memref<1x8x32xf32, #tpu.memory_space<vmem>>, vector<1x8x32xf32>
    tpu.vector_store %arg6[%c0_14, %c0_15, %c0_16], %24 {strides = array<i32>} : memref<1x8x32xf32, #tpu.memory_space<vmem>>, vector<1x8x32xf32>,
    return
  }
  func.func @transform_0(%arg0: i32) -> (i32, i32, i32) {
    %c0_i32 = arith.constant 0 : i32
    %c0_i32_0 = arith.constant 0 : i32
    %c0_i32_1 = arith.constant 0 : i32
    return %arg0, %c0_i32, %c0_i32_0 : i32, i32, i32
  }
  func.func @transform_1(%arg0: i32) -> (i32, i32, i32) {
    %c0_i32 = arith.constant 0 : i32
    %c0_i32_0 = arith.constant 0 : i32
    %c0_i32_1 = arith.constant 0 : i32
    return %arg0, %c0_i32, %c0_i32_0 : i32, i32, i32
  }
  func.func @transform_2(%arg0: i32) -> (i32, i32) {
    %c0_i32 = arith.constant 0 : i32
    %c0_i32_0 = arith.constant 0 : i32
    %c0_i32_1 = arith.constant 0 : i32
    return %c0_i32, %c0_i32_0 : i32, i32
  }
  func.func @transform_3(%arg0: i32) -> (i32, i32) {
    %c0_i32 = arith.constant 0 : i32
    %c0_i32_0 = arith.constant 0 : i32
    %c0_i32_1 = arith.constant 0 : i32
    return %c0_i32, %c0_i32_0 : i32, i32
  }
  func.func @transform_4(%arg0: i32) -> (i32, i32) {
    %c0_i32 = arith.constant 0 : i32
    %c0_i32_0 = arith.constant 0 : i32
    %c0_i32_1 = arith.constant 0 : i32
    return %c0_i32, %c0_i32_0 : i32, i32
  }
  func.func @transform_5(%arg0: i32) -> (i32, i32, i32) {
    %c0_i32 = arith.constant 0 : i32
    %c0_i32_0 = arith.constant 0 : i32
    %c0_i32_1 = arith.constant 0 : i32
    return %arg0, %c0_i32, %c0_i32_0 : i32, i32, i32
  }
}

</mosaic_0001>

<bundles_post_ra>
// kernel: fft_loss.1
= control target key start
LH: loop header
LB: loop body
LE: loop exit
PB: predicated region body
PF: predicated region fallthrough
CT: control target
= control target key end

     0   :  { %10 = vsyncpa [#allocation3], 0  ;;  %s3013_s0 = inlined_call_operand.vmem [shape: f32[8,16,16], index: 0, kind: input, shape index: {}]   ;;  %s3014_s1 = inlined_call_operand.hbm [shape: f32[8,16,16], index: 1, kind: input, shape index: {}]   ;;  %s3015_s2 = inlined_call_operand.vmem [shape: bf16[16,256], index: 2, kind: input, shape index: {}]   ;;  %s3016_s3 = inlined_call_operand.vmem [shape: bf16[16,32], index: 3, kind: input, shape index: {}]   ;;  %s3017_s4 = inlined_call_operand.vmem [shape: bf16[16,32], index: 4, kind: input, shape index: {}]   ;;  %s3018_s5 = inlined_call_operand.vmem [shape: f32[2,8,32], index: 5, kind: output, shape index: {}]  }
   0x1   :  { %12 = vsyncpa [#allocation3 + $0x1], 0  ;;  %s2527_s18 = smov 0   ;;  %s2529_s19 = smov 0  }
   0x2   :  { %s2531_s20 = smov 0   ;;  %s2533_s21 = smov 0  }
   0x3 LB: > { %s2546_s22 = sadd.s32 4294967295, %s2491_s21   ;;  %s2549_s23 = sadd.s32 1, %s2491_s21   ;;  %s2491_s21 = sphi %s2533_s21, %s3025_s21   ;;  %s2487_s20 = sphi %s2531_s20, %s3024_s20   ;;  %s2483_s19 = sphi %s2529_s19, %s3023_s19   ;;  %s2479_s18 = sphi %s2527_s18, %s3022_s18  }
   0x4   : > { %s48_s24 = ssub.s32 %s2491_s21, %s2549_s23  ;;  %s51_s25 = sadd.s32 1, %s2487_s20 }
   0x5   : > { %p49_p0 = scmp.eq.s32.totalorder %s48_s24, 0  ;;  %p58_p1 = scmp.ne.s32.totalorder %s2487_s20, %s2483_s19 }
   0x6   : > { %p59_p2 = scmp.eq.s32.totalorder %s2491_s21, 0  ;;  %p64_p3 = scmp.ne.s32.totalorder %s2483_s19, %s2479_s18 }
   0x7   : > { %s2559_s26 = scalar_select %p49_p0, %s2487_s20, %s51_s25  }
   0x8   : > { %p60_p4 = por %p59_p2, %p58_p1  ;;  %p65_p5 = scmp.eq.s32.totalorder %s2546_s22, 0 }
   0x9   : > { %p2133_p6 = scmp.lt.s32.totalorder %s2491_s21, 2  ;;  %s196_s28 = sand.u32 1, %s2487_s20  }
   0xa   : > { %p2563_p7 = por %p65_p5, %p64_p3  ;;  %s1776_s29 = sshll.u32 %s196_s28, 6 }
   0xb   : > { %s1861_s30 = sshll.u32 %s2491_s21, 10  ;;  %s200_s9 = scalar_lea.vmem [#allocation2], %s1776_s29 }
   0xc   : > { %s2572_s8 = scalar_lea.hbm %s3014_s1, %s1861_s30  ;;  %s208_s10 = sshll.u32 %s200_s9, 4  ;;  %s2574_s10 = int_to_ptr.vmem [resolvable:$true] %s208_s10 }
   0xd   : > { %p2576_p8 = pnand %p2133_p6, %p60_p4  ;;  %s2581_s12 = scalar_lea.sflag [#allocation3], %s196_s28 }
   0xe   : > { %s2427_s13 = scalar_lea.hbm %s2572_s8, 1024  ;;  %s2432_s16 = scalar_lea.hbm %s3014_s1, 2048 }
   0xf   : > { %p2428_p10 = scmp.ne.s32.totalorder %s2572_s8, %s2427_s13  ;;  %p2429_p11 = pneg %p2576_p8 }
  0x10   : > { %p2433_p0 = scmp.lt.u32.totalorder %s2572_s8, %s3014_s1  ;;  %p2434_p1 = scmp.lt.u32.totalorder %s2432_s16, %s2427_s13 }
  0x11   : > { %p2430_p12 = pnand %p2429_p11, %p2428_p10  ;;  %p2436_p3 = scmp.lt.u32.totalorder %s2427_s13, %s2572_s8 }
  0x12   : > { %p2435_p2 = por %p2434_p1, %p2433_p0 }
  0x13   : > { %p2431_p13 = pneg %p2430_p12 }
  0x14   : > { %p2437_p4 = por %p2436_p3, %p2435_p2 }
  0x16   : > { %p2438_p5 = pnand %p2437_p4, %p2431_p13 }
  0x18   : > { %2441 = shalt.err (!%p2438_p5)
}
  0x19   : > { %s2442_s24 = scalar_lea.vmem %s2574_s10, 1024  ;;  %s2493_s25 = smov [#allocation2]  }
  0x1a   : > { %p2443_p6 = scmp.ne.s32.totalorder %s2574_s10, %s2442_s24  ;;  %s2447_s28 = sshll.u32 %s2493_s25, 4  ;;  %s2448_s28 = int_to_ptr.vmem [resolvable:$false] %s2447_s28 }
  0x1b   : > { %s2449_s29 = scalar_lea.vmem %s2448_s28, 2048  ;;  %p2450_p9 = scmp.lt.s32.totalorder %s2574_s10, %s2448_s28 }
  0x1c   : > { %p2445_p10 = pnand %p2443_p6, %p2429_p11  ;;  %p2451_p0 = scmp.lt.s32.totalorder %s2449_s29, %s2442_s24 }
  0x1e   : > { %p2446_p12 = pneg %p2445_p10  ;;  %p2452_p1 = por %p2451_p0, %p2450_p9 }
  0x20   : > { %p2453_p2 = pnand %p2452_p1, %p2446_p12 }
  0x22   : > { %2456 = shalt.err (!%p2453_p2)
}
  0x23   : > { %s2494_s30 = smov 128   ;;  %s2495_s6 = smov 8  }
  0x24   : > { %2132 = dma.hbm_to_vmem [thread:$0]  (!%p2576_p8), %s2572_s8, 1024, %s2574_s10, %s2581_s12, %s2494_s30, %s2494_s30, %s2495_s6  }
  0x25   : > { %p216_p11 = scmp.lt.s32.totalorder %s2491_s21, 3  ;;  %p3021_p13 = scmp.ge.s32.totalorder %s2491_s21, 1 }
  0x27   : > { %p217_p3 = pnand %p3021_p13, %p216_p11 }
  0x28   : > { %s222_s7 = sand.u32 (!%p217_p3), 1, %s2483_s19  }
  0x29   : > { %220 = sbr.rel (%p217_p3) target bundleno = 847 (0x34f), region = 40  ;;  %s1781_s9 = sshll.u32 (!%p217_p3), %s222_s7, 6 }
  0x2a   : > { %s223_s13 = scalar_lea.sflag (!%p217_p3), [#allocation3], %s222_s7  ;;  %s2613_s14 = scalar_lea.vmem (!%p217_p3), [#allocation2], %s1781_s9 }
  0x30   : > { %2474 = dma.done.wait (%p2563_p7), %s223_s13, 1024  }
  0x31   : > { %2476 = vsyncadd (%p2563_p7), %s223_s13, 4294966272  ;;  %s1782_s8 = sshll.u32 %s2546_s22, 2  ;;  %v2496_v0 = vmov 0   ;;  %v2422_v1 = vld [vmem:[%s3015_s2 + $0x4] ss:$8 sps:$4 sm:$0xff]   ;;  %vm311_vm0 = vcmask 130048  }
  0x32   : > { %356 = vmatprep.mubr.bf16.mxu0 %v2496_v0  ;;  %p259_p8 = scmp.lt.s32.totalorder %s1782_s8, 7  ;;  %v2424_v2 = vld [vmem:[%s3015_s2] ss:$8 sps:$4 sm:$0xff]   ;;  %324 = vmatprep.subr.bf16.mxu0 %v2422_v1  ;;  %v281_v11 = vld [vmem:[%s2613_s14 + $0x10] sm:$0xff]  ;;  %v282_v12 = vld [vmem:[%s2613_s14 + $0x18] sm:$0xff]  ;;  %vm1567_vm1 = vcmask 261120  }
  0x33   : > { %v279_v5 = vld [vmem:[%s2613_s14] sm:$0xff]  ;;  %v280_v6 = vld [vmem:[%s2613_s14 + $0x8] sm:$0xff]  ;;  %325 = vmatpush1.bf16.msra.mxu0 %v2424_v2  ;;  %v285_v26 = vld [vmem:[%s2613_s14 + $0x30] sm:$0xff]  ;;  %p266_p7 = scmp.lt.s32.totalorder %s2546_s22, 1 }
  0x34   : > { %s3027_s8 = smov (!%p259_p8, %s1782_s8), 7  ;;  %v283_v19 = vld [vmem:[%s2613_s14 + $0x20] sm:$0xff]  ;;  %v284_v20 = vld [vmem:[%s2613_s14 + $0x28] sm:$0xff]  ;;  %v286_v27 = vld [vmem:[%s2613_s14 + $0x38] sm:$0xff] }
  0x35   : > { %s1862_s21 = sshll.u32 %s3027_s8, 4  ;;  %v2425_v53 = vld [vmem:[%s3017_s4] sm:$0xff]   ;;  %s3029_s22 = smov (!%p266_p7, %s2546_s22), 1 }
  0x36   : > { %s2623_s12 = scalar_lea.vmem %s3013_s0, %s1862_s21  ;;  %1929 = vmatprep.subr.bf16.mxu0 %v2425_v53  ;;  %2061 = vmatprep.subr.bf16.mxu1 %v2425_v53  ;;  %v2657_v54 = vld [vmem:[%s3016_s3] sm:$0xff]   ;;  %s1785_s29 = sshll.u32 %s3029_s22, 3 }
  0x37   : > { %v271_v3 = vld [vmem:[%s2623_s12] sm:$0xff]  ;;  %v272_v4 = vld [vmem:[%s2623_s12 + $0x8] sm:$0xff]  ;;  %v273_v9 = vld [vmem:[%s2623_s12 + $0x10] sm:$0xff]  ;;  %2062 = vmatpush3.bf16.msra.mxu1 %v2425_v53  ;;  %s269_s7 = scalar_lea.vmem %s3018_s5, %s1785_s29 }
  0x38   : > { %v287_v7 = vsub.f32 %v271_v3, %v279_v5  ;;  %v288_v8 = vsub.f32 %v272_v4, %v280_v6  ;;  %v274_v10 = vld [vmem:[%s2623_s12 + $0x18] sm:$0xff]  ;;  %v289_v14 = vsub.f32 %v273_v9, %v281_v11  ;;  %v275_v17 = vld [vmem:[%s2623_s12 + $0x20] sm:$0xff]  ;;  %v276_v18 = vld [vmem:[%s2623_s12 + $0x28] sm:$0xff]  ;;  %1995 = vmatprep.subr.bf16.mxu1 %v2657_v54 }
  0x39   : > { %v290_v15 = vsub.f32 %v274_v10, %v282_v12  ;;  %v291_v21 = vsub.f32 %v275_v17, %v283_v19  ;;  %v292_v22 = vsub.f32 %v276_v18, %v284_v20  ;;  %v277_v24 = vld [vmem:[%s2623_s12 + $0x30] sm:$0xff]  ;;  %v278_v25 = vld [vmem:[%s2623_s12 + $0x38] sm:$0xff] }
  0x3a   : > { %v295_v13 = vpack.c.bf16 %v288_v8, %v287_v7  ;;  %v293_v28 = vsub.f32 %v277_v24, %v285_v26  ;;  %v294_v29 = vsub.f32 %v278_v25, %v286_v27 }
  0x3b   : > { %v296_v16 = vpack.c.bf16 %v290_v15, %v289_v14  ;;  %v297_v23 = vpack.c.bf16 %v292_v22, %v291_v21 }
  0x3c   : > { %1788 = vmatmul.mubr.msk.bf16.vlgmr.msra.gmra.mrb[0].mxu0 %vm311_vm0, %v295_v13  ;;  %v298_v30 = vpack.c.bf16 %v294_v29, %v293_v28 }
  0x3d   : > { %366 = vmatprep.mubr.bf16.mxu0 %v2496_v0  ;;  %1930 = vmatpush3.bf16.msra.mxu0 %v2425_v53 }
  0x44   : > { %1789 = vmatmul.mubr.msk.bf16.gmra.mrb[4].mxu0 %vm311_vm0, %v296_v16 }
  0x45   : > { %376 = vmatprep.mubr.bf16.mxu0 %v2496_v0 }
  0x4c   : > { %1790 = vmatmul.mubr.msk.bf16.gmra.mrb[8].mxu0 %vm311_vm0, %v297_v23 }
  0x4d   : > { %386 = vmatprep.mubr.bf16.mxu0 %v2496_v0 }
  0x54   : > { %1791 = vmatmul.mubr.msk.bf16.gmra.mrb[12].mxu0 %vm311_vm0, %v298_v30 }
 0x10f   : > { %v358_v31 = vpop.f32.mrb[0].mxu0 }
 0x110   : > { %v360_v32 = vpop.f32.mrb[1].mxu0 }
 0x111   : > { %v362_v33 = vpop.f32.mrb[2].mxu0 }
 0x112   : > { %v364_v34 = vpop.f32.mrb[3].mxu0 }
 0x117   : > { %v368_v35 = vpop.f32.mrb[4].mxu0 }
 0x118   : > { %v370_v36 = vpop.f32.mrb[5].mxu0  ;;  %v2254_v37 = vpack.i.bf16 %v368_v35, %v360_v32 }
 0x119   : > { %v372_v38 = vpop.f32.mrb[6].mxu0 }
 0x11a   : > { %v2256_v39 = vpack.i.bf16 %v372_v38, %v364_v34  ;;  %2255 = vxpose.xlu1.b32.start [1/2] (short) %v2254_v37, 128  ;;  %v374_v40 = vpop.f32.mrb[7].mxu0 }
 0x11e   : > { %2257 = vxpose.xlu1.b32.end [2/2] (short) %v2256_v39, 128 }
 0x11f   : > { %v378_v41 = vpop.f32.mrb[8].mxu0 }
 0x120   : > { %v2338_v42 = vpack.i.bf16 %v378_v41, %v370_v36  ;;  %v380_v43 = vpop.f32.mrb[9].mxu0 }
 0x121   : > { %v382_v44 = vpop.f32.mrb[10].mxu0 }
 0x122   : > { %v2340_v45 = vpack.i.bf16 %v382_v44, %v374_v40  ;;  %v384_v46 = vpop.f32.mrb[11].mxu0 }
 0x127   : > { %v388_v47 = vpop.f32.mrb[12].mxu0 }
 0x128   : > { %v390_v48 = vpop.f32.mrb[13].mxu0 }
 0x129   : > { %v392_v49 = vpop.f32.mrb[14].mxu0  ;;  %v2170_v50 = vpack.i.bf16 %v358_v31, %v390_v48 }
 0x12a   : > { %v394_v51 = vpop.f32.mrb[15].mxu0 }
 0x12b   : > { %v2172_v52 = vpack.i.bf16 %v362_v33, %v394_v51  ;;  %2171 = vxpose.xlu0.b32.start [1/2] (short) %v2170_v50, 128 }
 0x12f   : > { %2173 = vxpose.xlu0.b32.end [2/2] (short) %v2172_v52, 128 }
 0x157   : > { %621 = vxpose.xlu1.b32.start [1/2] (short) %v380_v43, 128 }
 0x15b   : > { %622 = vxpose.xlu1.b32.end [2/2] (short) %v384_v46, 128 }
 0x168   : > { %2339 = vxpose.xlu0.b32.start [1/2] (short) %v2338_v42, 128 }
 0x16c   : > { %2341 = vxpose.xlu0.b32.end [2/2] (short) %v2340_v45, 128 }
 0x19a   : > { %v2258_v55 = vpop.trf.xlu1 }
 0x19b   : > { %v2262_v56 = vunpack.i.h.bf16 %v2258_v55  ;;  %v2259_v57 = vunpack.i.l.bf16 %v2258_v55 }
 0x19e   : > { %v2263_v58 = vpop.trf.xlu1 }
 0x19f   : > { %v2267_v59 = vunpack.i.h.bf16 %v2263_v58  ;;  %v2264_v60 = vunpack.i.l.bf16 %v2263_v58 }
 0x1a1   : > { %v685_v61 = vpack.c.bf16 %v2264_v60, %v2259_v57  ;;  %v2660_v62 = vpack.c.bf16 %v2267_v59, %v2262_v56 }
 0x1a2   : > { %v2268_v63 = vpop.trf.xlu1 }
 0x1a3   : > { %1931 = vmatprep.mubr.msk.bf16.mxu0 %vm311_vm0, %v685_v61  ;;  %v2272_v0 = vunpack.i.h.bf16 %v2268_v63  ;;  %v2269_v1 = vunpack.i.l.bf16 %v2268_v63 }
 0x1a5   : > { %493 = vxpose.xlu0.b32.start [1/2] (short) %v388_v47, 128 }
 0x1a6   : > { %v2273_v2 = vpop.trf.xlu1 }
 0x1a7   : > { %v2277_v3 = vunpack.i.h.bf16 %v2273_v2  ;;  %v2274_v4 = vunpack.i.l.bf16 %v2273_v2 }
 0x1a9   : > { %494 = vxpose.xlu0.b32.end [2/2] (short) %v392_v49, 128  ;;  %v686_v5 = vpack.c.bf16 %v2274_v4, %v2269_v1  ;;  %v2663_v6 = vpack.c.bf16 %v2277_v3, %v2272_v0 }
 0x1aa   : > { %v2278_v7 = vpop.trf.xlu1 }
 0x1ab   : > { %v2665_v8 = vpop.trf.xlu0  ;;  %1932 = vmatmul.mubr.msk.bf16.vlgmr.msra.gmra.mrb[16].mxu0 %vm311_vm0, %v686_v5  ;;  %v2282_v9 = vunpack.i.h.bf16 %v2278_v7  ;;  %v2279_v10 = vunpack.i.l.bf16 %v2278_v7 }
 0x1ac   : > { %v2175_v15 = vunpack.i.l.bf16 %v2665_v8 }
 0x1ae   : > { %v2283_v11 = vpop.trf.xlu1 }
 0x1af   : > { %v2668_v12 = vpop.trf.xlu0  ;;  %v2287_v13 = vunpack.i.h.bf16 %v2283_v11  ;;  %v2284_v14 = vunpack.i.l.bf16 %v2283_v11 }
 0x1b0   : > { %v2180_v16 = vunpack.i.l.bf16 %v2668_v12 }
 0x1b1   : > { %v687_v17 = vpack.c.bf16 %v2284_v14, %v2279_v10  ;;  %v2672_v18 = vpack.c.bf16 %v2287_v13, %v2282_v9 }
 0x1b2   : > { %v2288_v19 = vpop.trf.xlu1  ;;  %v2674_v20 = vpack.c.bf16 %v2180_v16, %v2175_v15 }
 0x1b3   : > { %v2676_v21 = vpop.trf.xlu0  ;;  %1935 = vmatprep.mubr.msk.bf16.mxu0 %vm311_vm0, %v687_v17  ;;  %v2292_v22 = vunpack.i.h.bf16 %v2288_v19  ;;  %v2289_v23 = vunpack.i.l.bf16 %v2288_v19 }
 0x1b4   : > { %v2185_v28 = vunpack.i.l.bf16 %v2676_v21 }
 0x1b6   : > { %v2293_v24 = vpop.trf.xlu1 }
 0x1b7   : > { %v2679_v25 = vpop.trf.xlu0  ;;  %v2297_v26 = vunpack.i.h.bf16 %v2293_v24  ;;  %v2294_v27 = vunpack.i.l.bf16 %v2293_v24 }
 0x1b8   : > { %v2190_v29 = vunpack.i.l.bf16 %v2679_v25 }
 0x1b9   : > { %v688_v30 = vpack.c.bf16 %v2294_v27, %v2289_v23  ;;  %v2683_v31 = vpack.c.bf16 %v2297_v26, %v2292_v22 }
 0x1ba   : > { %v2298_v32 = vpop.trf.xlu1  ;;  %v2685_v33 = vpack.c.bf16 %v2190_v29, %v2185_v28 }
 0x1bb   : > { %v2687_v34 = vpop.trf.xlu0  ;;  %1936 = vmatmul.mubr.msk.bf16.gmra.mrb[20].mxu0 %vm311_vm0, %v688_v30  ;;  %v2302_v35 = vunpack.i.h.bf16 %v2298_v32  ;;  %v2299_v36 = vunpack.i.l.bf16 %v2298_v32 }
 0x1bc   : > { %v2195_v41 = vunpack.i.l.bf16 %v2687_v34 }
 0x1be   : > { %v2303_v37 = vpop.trf.xlu1 }
 0x1bf   : > { %v2690_v38 = vpop.trf.xlu0  ;;  %v2307_v39 = vunpack.i.h.bf16 %v2303_v37  ;;  %v2304_v40 = vunpack.i.l.bf16 %v2303_v37 }
 0x1c0   : > { %v2200_v42 = vunpack.i.l.bf16 %v2690_v38 }
 0x1c1   : > { %v689_v43 = vpack.c.bf16 %v2304_v40, %v2299_v36  ;;  %v2694_v44 = vpack.c.bf16 %v2307_v39, %v2302_v35  ;;  %v2183_v40 = vunpack.i.h.bf16 %v2668_v12  ;;  %v2193_v12 = vunpack.i.h.bf16 %v2679_v25 }
 0x1c2   : > { %v2308_v45 = vpop.trf.xlu1  ;;  %v2696_v46 = vpack.c.bf16 %v2200_v42, %v2195_v41 }
 0x1c3   : > { %v2698_v47 = vpop.trf.xlu0  ;;  %1939 = vmatprep.mubr.msk.bf16.mxu0 %vm311_vm0, %v689_v43  ;;  %v2312_v48 = vunpack.i.h.bf16 %v2308_v45  ;;  %v2309_v49 = vunpack.i.l.bf16 %v2308_v45  ;;  %v2178_v45 = vunpack.i.h.bf16 %v2665_v8 }
 0x1c4   : > { %v2205_v55 = vunpack.i.l.bf16 %v2698_v47  ;;  %v2208_v25 = vunpack.i.h.bf16 %v2698_v47 }
 0x1c6   : > { %v2313_v50 = vpop.trf.xlu1 }
 0x1c7   : > { %v2701_v51 = vpop.trf.xlu0  ;;  %v2317_v52 = vunpack.i.h.bf16 %v2313_v50  ;;  %v2314_v53 = vunpack.i.l.bf16 %v2313_v50 }
 0x1c8   : > { %v2210_v56 = vunpack.i.l.bf16 %v2701_v51 }
 0x1c9   : > { %v690_v57 = vpack.c.bf16 %v2314_v53, %v2309_v49  ;;  %v2705_v58 = vpack.c.bf16 %v2317_v52, %v2312_v48  ;;  %v525_v49 = vpack.c.bf16 %v2183_v40, %v2178_v45  ;;  %v2188_v52 = vunpack.i.h.bf16 %v2676_v21 }
 0x1ca   : > { %v2318_v59 = vpop.trf.xlu1  ;;  %v2707_v60 = vpack.c.bf16 %v2210_v56, %v2205_v55  ;;  %v2203_v53 = vunpack.i.h.bf16 %v2690_v38  ;;  %v2213_v21 = vunpack.i.h.bf16 %v2701_v51 }
 0x1cb   : > { %v2709_v61 = vpop.trf.xlu0  ;;  %1940 = vmatmul.mubr.msk.bf16.gmra.mrb[24].mxu0 %vm311_vm0, %v690_v57  ;;  %v2322_v63 = vunpack.i.h.bf16 %v2318_v59  ;;  %v2319_v0 = vunpack.i.l.bf16 %v2318_v59  ;;  %v2198_v57 = vunpack.i.h.bf16 %v2687_v34  ;;  %v526_v59 = vpack.c.bf16 %v2193_v12, %v2188_v52 }
 0x1cc   : > { %v2215_v7 = vunpack.i.l.bf16 %v2709_v61 }
 0x1ce   : > { %v2323_v1 = vpop.trf.xlu1 }
 0x1cf   : > { %v2712_v2 = vpop.trf.xlu0  ;;  %v2327_v3 = vunpack.i.h.bf16 %v2323_v1  ;;  %v2324_v4 = vunpack.i.l.bf16 %v2323_v1  ;;  %v527_v1 = vpack.c.bf16 %v2203_v53, %v2198_v57 }
 0x1d0   : > { %v2220_v5 = vunpack.i.l.bf16 %v2712_v2  ;;  %v2223_v38 = vunpack.i.h.bf16 %v2712_v2 }
 0x1d1   : > { %v691_v9 = vpack.c.bf16 %v2324_v4, %v2319_v0  ;;  %v2716_v10 = vpack.c.bf16 %v2327_v3, %v2322_v63 }
 0x1d2   : > { %v713_v11 = vpack.c.bf16 %v2220_v5, %v2215_v7  ;;  %v2328_v13 = vpop.trf.xlu1  ;;  %v2218_v7 = vunpack.i.h.bf16 %v2709_v61 }
 0x1d3   : > { %v2718_v14 = vpop.trf.xlu0  ;;  %1943 = vmatprep.mubr.msk.bf16.mxu0 %vm311_vm0, %v691_v9  ;;  %v2332_v15 = vunpack.i.h.bf16 %v2328_v13  ;;  %v2329_v16 = vunpack.i.l.bf16 %v2328_v13  ;;  %v528_v13 = vpack.c.bf16 %v2213_v21, %v2208_v25 }
 0x1d4   : > { %1987 = vmatprep.mubr.msk.bf16.mxu1 %vm311_vm0, %v713_v11  ;;  %v2225_v24 = vunpack.i.l.bf16 %v2718_v14  ;;  %v2228_v51 = vunpack.i.h.bf16 %v2718_v14 }
 0x1d6   : > { %v2333_v17 = vpop.trf.xlu1 }
 0x1d7   : > { %v2722_v19 = vpop.trf.xlu0  ;;  %v2337_v22 = vunpack.i.h.bf16 %v2333_v17  ;;  %v2334_v23 = vunpack.i.l.bf16 %v2333_v17 }
 0x1d8   : > { %v2230_v26 = vunpack.i.l.bf16 %v2722_v19  ;;  %v2233_v47 = vunpack.i.h.bf16 %v2722_v19 }
 0x1d9   : > { %v692_v27 = vpack.c.bf16 %v2334_v23, %v2329_v16  ;;  %v2726_v28 = vpack.c.bf16 %v2337_v22, %v2332_v15  ;;  %v529_v16 = vpack.c.bf16 %v2223_v38, %v2218_v7 }
 0x1da   : > { %v714_v29 = vpack.c.bf16 %v2230_v26, %v2225_v24  ;;  %v2747_v50 = vpop.trf.xlu1 }
 0x1db   : > { %v2728_v30 = vpop.trf.xlu0  ;;  %1944 = vmatmul.mubr.msk.bf16.gmra.mrb[28].mxu0 %vm311_vm0, %v692_v27  ;;  %v530_v27 = vpack.c.bf16 %v2233_v47, %v2228_v51 }
 0x1dc   : > { %1988 = vmatmul.mubr.msk.bf16.vlgmr.msra.gmra.mrb[0].mxu1 %vm311_vm0, %v714_v29  ;;  %v2235_v35 = vunpack.i.l.bf16 %v2728_v30  ;;  %v2238_v24 = vunpack.i.h.bf16 %v2728_v30 }
 0x1dd   : > { %1996 = vmatpush3.bf16.msra.mxu1 %v2657_v54 }
 0x1de   : > { %v2759_v3 = vpop.trf.xlu1 }
 0x1df   : > { %v2239_v32 = vpop.trf.xlu0 }
 0x1e0   : > { %v2240_v36 = vunpack.i.l.bf16 %v2239_v32  ;;  %v2243_v2 = vunpack.i.h.bf16 %v2239_v32 }
 0x1e2   : > { %v715_v37 = vpack.c.bf16 %v2240_v36, %v2235_v35  ;;  %v2772_v9 = vpop.trf.xlu1  ;;  %v531_v35 = vpack.c.bf16 %v2243_v2, %v2238_v24 }
 0x1e3   : > { %v2734_v39 = vpop.trf.xlu0 }
 0x1e4   : > { %1991 = vmatprep.mubr.msk.bf16.mxu1 %vm311_vm0, %v715_v37  ;;  %v2245_v42 = vunpack.i.l.bf16 %v2734_v39  ;;  %v2248_v32 = vunpack.i.h.bf16 %v2734_v39 }
 0x1e6   : > { %v2783_v61 = vpop.trf.xlu1 }
 0x1e7   : > { %v2738_v41 = vpop.trf.xlu0  ;;  %v702_v2 = vpack.c.bf16 %v2783_v61, %v2772_v9 }
 0x1e8   : > { %v2250_v43 = vunpack.i.l.bf16 %v2738_v41  ;;  %v2253_v19 = vunpack.i.h.bf16 %v2738_v41 }
 0x1ea   : > { %v716_v54 = vpack.c.bf16 %v2250_v43, %v2245_v42  ;;  %v2793_v14 = vpop.trf.xlu1  ;;  %v532_v42 = vpack.c.bf16 %v2253_v19, %v2248_v32 }
 0x1eb   : > { %v2743_v48 = vpop.trf.xlu0 }
 0x1ec   : > { %1992 = vmatmul.mubr.msk.bf16.gmra.mrb[4].mxu1 %vm311_vm0, %v716_v54  ;;  %v2343_v8 = vunpack.i.l.bf16 %v2743_v48  ;;  %v2346_v7 = vunpack.i.h.bf16 %v2743_v48 }
 0x1ed   : > { %1997 = vmatprep.mubr.msk.bf16.mxu1 %vm311_vm0, %v525_v49 }
 0x1ee   : > { %v642_v45 = vpop.trf.xlu1 }
 0x1ef   : > { %v2752_v55 = vpop.trf.xlu0 }
 0x1f0   : > { %v2348_v56 = vunpack.i.l.bf16 %v2752_v55 }
 0x1f2   : > { %v693_v63 = vpack.c.bf16 %v2348_v56, %v2343_v8  ;;  %v2811_v49 = vpop.trf.xlu1 }
 0x1f3   : > { %v2757_v0 = vpop.trf.xlu0 }
 0x1f4   : > { %1947 = vmatprep.mubr.msk.bf16.mxu0 %vm311_vm0, %v693_v63  ;;  %1998 = vmatmul.mubr.msk.bf16.vlgmr.msra.gmra.mrb[8].mxu1 %vm311_vm0, %v526_v59  ;;  %v2353_v4 = vunpack.i.l.bf16 %v2757_v0 }
 0x1f5   : > { %2001 = vmatprep.mubr.msk.bf16.mxu1 %vm311_vm0, %v527_v1 }
 0x1f6   : > { %v644_v53 = vpop.trf.xlu1 }
 0x1f7   : > { %v2767_v34 = vpop.trf.xlu0 }
 0x1f8   : > { %v2358_v5 = vunpack.i.l.bf16 %v2767_v34 }
 0x1fa   : > { %v694_v11 = vpack.c.bf16 %v2358_v5, %v2353_v4 }
 0x1fb   : > { %v2774_v15 = vpop.trf.xlu0 }
 0x1fc   : > { %1948 = vmatmul.mubr.msk.bf16.gmra.mrb[32].mxu0 %vm311_vm0, %v694_v11  ;;  %2002 = vmatmul.mubr.msk.bf16.gmra.mrb[12].mxu1 %vm311_vm0, %v528_v13  ;;  %v2363_v22 = vunpack.i.l.bf16 %v2774_v15 }
 0x1fd   : > { %2005 = vmatprep.mubr.msk.bf16.mxu1 %vm311_vm0, %v529_v16  ;;  %v701_v16 = vpack.c.bf16 %v2759_v3, %v2747_v50  ;;  %v2356_v50 = vunpack.i.h.bf16 %v2757_v0  ;;  %v2366_v3 = vunpack.i.h.bf16 %v2774_v15 }
 0x1ff   : > { %v2781_v17 = vpop.trf.xlu0 }
 0x200   : > { %v2368_v23 = vunpack.i.l.bf16 %v2781_v17  ;;  %v2371_v48 = vunpack.i.h.bf16 %v2781_v17 }
 0x202   : > { %v695_v26 = vpack.c.bf16 %v2368_v23, %v2363_v22  ;;  %v543_v24 = vpack.c.bf16 %v2371_v48, %v2366_v3 }
 0x203   : > { %v2788_v29 = vpop.trf.xlu0 }
 0x204   : > { %1951 = vmatprep.mubr.msk.bf16.mxu0 %vm311_vm0, %v695_v26  ;;  %2006 = vmatmul.mubr.msk.bf16.gmra.mrb[16].mxu1 %vm311_vm0, %v530_v27  ;;  %v2373_v30 = vunpack.i.l.bf16 %v2788_v29  ;;  %v2376_v9 = vunpack.i.h.bf16 %v2788_v29  ;;  %v704_v26 = vpack.c.bf16 %v644_v53, %v2811_v49 }
 0x205   : > { %2009 = vmatprep.mubr.msk.bf16.mxu1 %vm311_vm0, %v531_v35 }
 0x207   : > { %v2797_v36 = vpop.trf.xlu0 }
 0x208   : > { %v2378_v37 = vunpack.i.l.bf16 %v2797_v36  ;;  %v2381_v0 = vunpack.i.h.bf16 %v2797_v36 }
 0x20a   : > { %v696_v40 = vpack.c.bf16 %v2378_v37, %v2373_v30  ;;  %v544_v27 = vpack.c.bf16 %v2381_v0, %v2376_v9 }
 0x20b   : > { %v2801_v43 = vpop.trf.xlu0 }
 0x20c   : > { %1952 = vmatmul.mubr.msk.bf16.gmra.mrb[36].mxu0 %vm311_vm0, %v696_v40  ;;  %2010 = vmatmul.mubr.msk.bf16.gmra.mrb[20].mxu1 %vm311_vm0, %v532_v42  ;;  %v2383_v39 = vunpack.i.l.bf16 %v2801_v43  ;;  %v2386_v61 = vunpack.i.h.bf16 %v2801_v43 }
 0x20d   : > { %2013 = vmatprep.mubr.msk.bf16.mxu1 %vm311_vm0, %v2660_v62 }
 0x20f   : > { %v2807_v41 = vpop.trf.xlu0 }
 0x210   : > { %v2388_v54 = vunpack.i.l.bf16 %v2807_v41  ;;  %v2391_v15 = vunpack.i.h.bf16 %v2807_v41 }
 0x212   : > { %v697_v12 = vpack.c.bf16 %v2388_v54, %v2383_v39  ;;  %v545_v32 = vpack.c.bf16 %v2391_v15, %v2386_v61 }
 0x213   : > { %v2813_v52 = vpop.trf.xlu0 }
 0x214   : > { %1955 = vmatprep.mubr.msk.bf16.mxu0 %vm311_vm0, %v697_v12  ;;  %2014 = vmatmul.mubr.msk.bf16.gmra.mrb[24].mxu1 %vm311_vm0, %v2663_v6  ;;  %v2393_v8 = vunpack.i.l.bf16 %v2813_v52  ;;  %v645_v6 = vpop.trf.xlu1  ;;  %v2396_v37 = vunpack.i.h.bf16 %v2813_v52 }
 0x215   : > { %2017 = vmatprep.mubr.msk.bf16.mxu1 %vm311_vm0, %v2672_v18 }
 0x217   : > { %v2820_v62 = vpop.trf.xlu0 }
 0x218   : > { %v2398_v56 = vunpack.i.l.bf16 %v2820_v62  ;;  %v646_v38 = vpop.trf.xlu1  ;;  %v2401_v36 = vunpack.i.h.bf16 %v2820_v62 }
 0x219   : > { %v705_v35 = vpack.c.bf16 %v646_v38, %v645_v6 }
 0x21a   : > { %v698_v57 = vpack.c.bf16 %v2398_v56, %v2393_v8 }
 0x21b   : > { %v2824_v59 = vpop.trf.xlu0 }
 0x21c   : > { %1956 = vmatmul.mubr.msk.bf16.gmra.mrb[40].mxu0 %vm311_vm0, %v698_v57  ;;  %2018 = vmatmul.mubr.msk.bf16.gmra.mrb[28].mxu1 %vm311_vm0, %v2683_v31  ;;  %v2403_v63 = vunpack.i.l.bf16 %v2824_v59  ;;  %v2351_v31 = vunpack.i.h.bf16 %v2752_v55  ;;  %v647_v11 = vpop.trf.xlu1  ;;  %v2406_v40 = vunpack.i.h.bf16 %v2824_v59 }
 0x21d   : > { %2021 = vmatprep.mubr.msk.bf16.mxu1 %vm311_vm0, %v2694_v44 }
 0x21f   : > { %v2831_v18 = vpop.trf.xlu0 }
 0x220   : > { %v2408_v1 = vunpack.i.l.bf16 %v2831_v18  ;;  %v648_v51 = vpop.trf.xlu1  ;;  %v2411_v29 = vunpack.i.h.bf16 %v2831_v18 }
 0x221   : > { %v706_v43 = vpack.c.bf16 %v648_v51, %v647_v11 }
 0x222   : > { %v699_v21 = vpack.c.bf16 %v2408_v1, %v2403_v63  ;;  %v547_v54 = vpack.c.bf16 %v2411_v29, %v2406_v40 }
 0x223   : > { %v2835_v25 = vpop.trf.xlu0 }
 0x224   : > { %1959 = vmatprep.mubr.msk.bf16.mxu0 %vm311_vm0, %v699_v21  ;;  %2022 = vmatmul.mubr.msk.bf16.gmra.mrb[32].mxu1 %vm311_vm0, %v2705_v58  ;;  %v2413_v4 = vunpack.i.l.bf16 %v2835_v25  ;;  %v541_v58 = vpack.c.bf16 %v2351_v31, %v2346_v7  ;;  %v2416_v62 = vunpack.i.h.bf16 %v2835_v25 }
 0x225   : > { %2025 = vmatprep.mubr.msk.bf16.mxu1 %vm311_vm0, %v2716_v10  ;;  %v2361_v10 = vunpack.i.h.bf16 %v2767_v34  ;;  %v649_v34 = vpop.trf.xlu1 }
 0x227   : > { %v2843_v44 = vpop.trf.xlu0  ;;  %v542_v22 = vpack.c.bf16 %v2361_v10, %v2356_v50 }
 0x228   : > { %v2418_v5 = vunpack.i.l.bf16 %v2843_v44  ;;  %v2421_v49 = vunpack.i.h.bf16 %v2843_v44 }
 0x229   : > { %v650_v19 = vpop.trf.xlu1 }
 0x22a   : > { %v700_v13 = vpack.c.bf16 %v2418_v5, %v2413_v4  ;;  %v707_v41 = vpack.c.bf16 %v650_v19, %v649_v34  ;;  %v548_v8 = vpack.c.bf16 %v2421_v49, %v2416_v62 }
 0x22b   : > { %v2850_v47 = vpop.trf.xlu0 }
 0x22c   : > { %1960 = vmatmul.mubr.msk.bf16.gmra.mrb[44].mxu0 %vm311_vm0, %v700_v13  ;;  %2026 = vmatmul.mubr.msk.bf16.gmra.mrb[36].mxu1 %vm311_vm0, %v2726_v28  ;;  %v703_v28 = vpack.c.bf16 %v642_v45, %v2793_v14  ;;  %v546_v45 = vpack.c.bf16 %v2401_v36, %v2396_v37 }
 0x22d   : > { %1963 = vmatprep.mubr.msk.bf16.mxu0 %vm311_vm0, %v701_v16  ;;  %2029 = vmatprep.mubr.msk.bf16.mxu1 %vm311_vm0, %v541_v58  ;;  %v651_v42 = vpop.trf.xlu1 }
 0x22f   : > { %v510_v55 = vpop.trf.xlu0 }
 0x230   : > { %v549_v56 = vpack.c.bf16 %v510_v55, %v2850_v47 }
 0x231   : > { %v652_v12 = vpop.trf.xlu1 }
 0x232   : > { %v708_v53 = vpack.c.bf16 %v652_v12, %v651_v42 }
 0x233   : > { %v511_v23 = vpop.trf.xlu0 }
 0x234   : > { %1964 = vmatmul.mubr.msk.bf16.gmra.mrb[48].mxu0 %vm311_vm0, %v702_v2  ;;  %2030 = vmatmul.mubr.msk.bf16.gmra.mrb[40].mxu1 %vm311_vm0, %v542_v22 }
 0x235   : > { %1967 = vmatprep.mubr.msk.bf16.mxu0 %vm311_vm0, %v703_v28  ;;  %2033 = vmatprep.mubr.msk.bf16.mxu1 %vm311_vm0, %v543_v24 }
 0x237   : > { %v512_v17 = vpop.trf.xlu0 }
 0x238   : > { %v550_v6 = vpack.c.bf16 %v512_v17, %v511_v23 }
 0x23b   : > { %v513_v14 = vpop.trf.xlu0 }
 0x23c   : > { %1968 = vmatmul.mubr.msk.bf16.gmra.mrb[52].mxu0 %vm311_vm0, %v704_v26  ;;  %2034 = vmatmul.mubr.msk.bf16.gmra.mrb[44].mxu1 %vm311_vm0, %v544_v27 }
 0x23d   : > { %1971 = vmatprep.mubr.msk.bf16.mxu0 %vm311_vm0, %v705_v35  ;;  %2037 = vmatprep.mubr.msk.bf16.mxu1 %vm311_vm0, %v545_v32 }
 0x23f   : > { %v514_v30 = vpop.trf.xlu0 }
 0x240   : > { %v551_v18 = vpack.c.bf16 %v514_v30, %v513_v14 }
 0x243   : > { %v515_v39 = vpop.trf.xlu0 }
 0x244   : > { %1972 = vmatmul.mubr.msk.bf16.gmra.mrb[56].mxu0 %vm311_vm0, %v706_v43  ;;  %2038 = vmatmul.mubr.msk.bf16.gmra.mrb[48].mxu1 %vm311_vm0, %v546_v45 }
 0x245   : > { %1975 = vmatprep.mubr.msk.bf16.mxu0 %vm311_vm0, %v707_v41  ;;  %2041 = vmatprep.mubr.msk.bf16.mxu1 %vm311_vm0, %v547_v54 }
 0x247   : > { %v516_v52 = vpop.trf.xlu0 }
 0x248   : > { %v552_v21 = vpack.c.bf16 %v516_v52, %v515_v39 }
 0x24b   : > { %v517_v57 = vpop.trf.xlu0 }
 0x24c   : > { %1976 = vmatmul.mubr.msk.bf16.gmra.mrb[60].mxu0 %vm311_vm0, %v708_v53  ;;  %2042 = vmatmul.mubr.msk.bf16.gmra.mrb[52].mxu1 %vm311_vm0, %v548_v8 }
 0x24d   : > { %1979 = vmatprep.mubr.msk.bf16.mxu0 %vm311_vm0, %v2674_v20  ;;  %2045 = vmatprep.mubr.msk.bf16.mxu1 %vm311_vm0, %v549_v56 }
 0x24f   : > { %v518_v59 = vpop.trf.xlu0 }
 0x250   : > { %v553_v25 = vpack.c.bf16 %v518_v59, %v517_v57 }
 0x253   : > { %v519_v63 = vpop.trf.xlu0 }
 0x254   : > { %1980 = vmatmul.mubr.msk.bf16.gmra.mrb[64].mxu0 %vm311_vm0, %v2685_v33  ;;  %2046 = vmatmul.mubr.msk.bf16.gmra.mrb[56].mxu1 %vm311_vm0, %v550_v6 }
 0x255   : > { %1983 = vmatprep.mubr.msk.bf16.mxu0 %vm311_vm0, %v2696_v46  ;;  %2049 = vmatprep.mubr.msk.bf16.mxu1 %vm311_vm0, %v551_v18 }
 0x257   : > { %v520_v1 = vpop.trf.xlu0 }
 0x258   : > { %v554_v33 = vpack.c.bf16 %v520_v1, %v519_v63 }
 0x25b   : > { %v521_v20 = vpop.trf.xlu0 }
 0x25c   : > { %1984 = vmatmul.mubr.msk.bf16.gmra.mrb[68].mxu0 %vm311_vm0, %v2707_v60  ;;  %2050 = vmatmul.mubr.msk.bf16.gmra.mrb[60].mxu1 %vm311_vm0, %v552_v21 }
 0x25d   : > { %2053 = vmatprep.mubr.msk.bf16.mxu1 %vm311_vm0, %v553_v25 }
 0x25f   : > { %v522_v38 = vpop.trf.xlu0 }
 0x260   : > { %v555_v31 = vpack.c.bf16 %v522_v38, %v521_v20 }
 0x263   : > { %v523_v44 = vpop.trf.xlu0 }
 0x264   : > { %2054 = vmatmul.mubr.msk.bf16.gmra.mrb[0].mxu1 %vm311_vm0, %v554_v33 }
 0x265   : > { %2057 = vmatprep.mubr.msk.bf16.mxu1 %vm311_vm0, %v555_v31 }
 0x267   : > { %v524_v46 = vpop.trf.xlu0 }
 0x268   : > { %v556_v4 = vpack.c.bf16 %v524_v46, %v523_v44 }
 0x26c   : > { %2058 = vmatmul.mubr.msk.bf16.gmra.mrb[4].mxu1 %vm311_vm0, %v556_v4 }
 0x27e   : > { %v1933_v5 = vpop.f32.mrb[16].mxu0 }
 0x27f   : > { %v857_v7 = vpop.f32.mrb[17].mxu0 }
 0x280   : > { %v1934_v11 = vpop.f32.mrb[18].mxu0 }
 0x281   : > { %v860_v60 = vpop.f32.mrb[19].mxu0 }
 0x28e   : > { %v1937_v13 = vpop.f32.mrb[20].mxu0 }
 0x28f   : > { %v873_v16 = vpop.f32.mrb[21].mxu0 }
 0x290   : > { %v1938_v47 = vpop.f32.mrb[22].mxu0 }
 0x291   : > { %v876_v58 = vpop.f32.mrb[23].mxu0 }
 0x29e   : > { %v1941_v10 = vpop.f32.mrb[24].mxu0 }
 0x29f   : > { %v889_v48 = vpop.f32.mrb[25].mxu0 }
 0x2a0   : > { %v1942_v55 = vpop.f32.mrb[26].mxu0 }
 0x2a1   : > { %v892_v51 = vpop.f32.mrb[27].mxu0 }
 0x2ae   : > { %v2906_v50 = vpop.f32.mrb[28].mxu0 }
 0x2af   : > { %v2908_v3 = vpop.f32.mrb[29].mxu0 }
 0x2b0   : > { %v2910_v2 = vpop.f32.mrb[30].mxu0 }
 0x2b1   : > { %v2912_v22 = vpop.f32.mrb[31].mxu0 }
 0x2c7   : > { %v1999_v28 = vpop.f32.mrb[8].mxu1 }
 0x2c8   : > { %v1257_v23 = vadd.f32 %v1999_v28, %v1933_v5  ;;  %v1248_v24 = vpop.f32.mrb[9].mxu1 }
 0x2c9   : > { %v1249_v34 = vadd.f32 %v1248_v24, %v857_v7  ;;  %v2000_v0 = vpop.f32.mrb[10].mxu1 }
 0x2ca   : > { %v1260_v15 = vadd.f32 %v2000_v0, %v1934_v11  ;;  %v1251_v17 = vpop.f32.mrb[11].mxu1  ;;  %v1505_v26 = vand.u32 2147483647, %v1257_v23 }
 0x2cb   : > { %v1503_v9 = vand.u32 2147483647, %v1249_v34  ;;  %v1252_v61 = vadd.f32 %v1251_v17, %v860_v60 }
 0x2cc   : > { %v1506_v14 = vand.u32 2147483647, %v1260_v15  ;;  %v1571_v42 = vsel %vm1567_vm1, %v1505_v26, 0.0 }
 0x2cd   : > { %v1504_v27 = vand.u32 2147483647, %v1252_v61  ;;  %v1568_v35 = vsel %vm1567_vm1, %v1503_v9, 0.0 }
 0x2ce   : > { %v1573_v52 = vsel %vm1567_vm1, %v1506_v14, 0.0 }
 0x2cf   : > { %v1569_v19 = vsel %vm1567_vm1, %v1504_v27, 0.0  ;;  %v2916_v32 = vpop.f32.mrb[32].mxu0  ;;  %v2003_v36 = vpop.f32.mrb[12].mxu1 }
 0x2d0   : > { %v1570_v29 = vadd.f32 %v1569_v19, %v1568_v35  ;;  %v1273_v30 = vadd.f32 %v2003_v36, %v1937_v13  ;;  %v2918_v37 = vpop.f32.mrb[33].mxu0  ;;  %v1264_v40 = vpop.f32.mrb[13].mxu1 }
 0x2d1   : > { %v1265_v43 = vadd.f32 %v1264_v40, %v873_v16  ;;  %v2921_v45 = vpop.f32.mrb[34].mxu0  ;;  %v2004_v41 = vpop.f32.mrb[14].mxu1 }
 0x2d2   : > { %v1572_v39 = vadd.f32 %v1571_v42, %v1570_v29  ;;  %v1276_v54 = vadd.f32 %v2004_v41, %v1938_v47  ;;  %v2923_v49 = vpop.f32.mrb[35].mxu0  ;;  %v1267_v12 = vpop.f32.mrb[15].mxu1  ;;  %v1509_v56 = vand.u32 2147483647, %v1273_v30 }
 0x2d3   : > { %v1507_v62 = vand.u32 2147483647, %v1265_v43  ;;  %v1268_v53 = vadd.f32 %v1267_v12, %v876_v58 }
 0x2d4   : > { %v1574_v8 = vadd.f32 %v1573_v52, %v1572_v39  ;;  %v1510_v18 = vand.u32 2147483647, %v1276_v54  ;;  %v1579_v38 = vsel %vm1567_vm1, %v1509_v56, 0.0 }
 0x2d5   : > { %v1575_v57 = vsel %vm1567_vm1, %v1507_v62, 0.0  ;;  %v1508_v59 = vand.u32 2147483647, %v1268_v53 }
 0x2d6   : > { %v1576_v6 = vadd.f32 %v1575_v57, %v1574_v8  ;;  %v1581_v5 = vsel %vm1567_vm1, %v1510_v18, 0.0 }
 0x2d7   : > { %v1577_v63 = vsel %vm1567_vm1, %v1508_v59, 0.0  ;;  %v2007_v1 = vpop.f32.mrb[16].mxu1 }
 0x2d8   : > { %v1578_v21 = vadd.f32 %v1577_v63, %v1576_v6  ;;  %v1289_v25 = vadd.f32 %v2007_v1, %v1941_v10  ;;  %v1280_v20 = vpop.f32.mrb[17].mxu1 }
 0x2d9   : > { %v1281_v33 = vadd.f32 %v1280_v20, %v889_v48  ;;  %v2008_v31 = vpop.f32.mrb[18].mxu1 }
 0x2da   : > { %v1580_v44 = vadd.f32 %v1579_v38, %v1578_v21  ;;  %v1292_v46 = vadd.f32 %v2008_v31, %v1942_v55  ;;  %v1283_v4 = vpop.f32.mrb[19].mxu1  ;;  %v1513_v13 = vand.u32 2147483647, %v1289_v25 }
 0x2db   : > { %v1511_v7 = vand.u32 2147483647, %v1281_v33  ;;  %v1284_v11 = vadd.f32 %v1283_v4, %v892_v51 }
 0x2dc   : > { %v1582_v60 = vadd.f32 %v1581_v5, %v1580_v44  ;;  %v1514_v28 = vand.u32 2147483647, %v1292_v46  ;;  %v1587_v15 = vsel %vm1567_vm1, %v1513_v13, 0.0 }
 0x2dd   : > { %v1583_v16 = vsel %vm1567_vm1, %v1511_v7, 0.0  ;;  %v1512_v47 = vand.u32 2147483647, %v1284_v11 }
 0x2de   : > { %v1584_v58 = vadd.f32 %v1583_v16, %v1582_v60  ;;  %v1589_v14 = vsel %vm1567_vm1, %v1514_v28, 0.0 }
 0x2df   : > { %v1585_v10 = vsel %vm1567_vm1, %v1512_v47, 0.0  ;;  %v1953_v23 = vpop.f32.mrb[36].mxu0  ;;  %v2011_v24 = vpop.f32.mrb[20].mxu1 }
 0x2e0   : > { %v1586_v48 = vadd.f32 %v1585_v10, %v1584_v58  ;;  %v1305_v34 = vadd.f32 %v2011_v24, %v2906_v50  ;;  %v937_v55 = vpop.f32.mrb[37].mxu0  ;;  %v1296_v0 = vpop.f32.mrb[21].mxu1 }
 0x2e1   : > { %v1297_v51 = vadd.f32 %v1296_v0, %v2908_v3  ;;  %v1954_v17 = vpop.f32.mrb[38].mxu0  ;;  %v2012_v9 = vpop.f32.mrb[22].mxu1 }
 0x2e2   : > { %v1588_v61 = vadd.f32 %v1587_v15, %v1586_v48  ;;  %v1308_v26 = vadd.f32 %v2012_v9, %v2910_v2  ;;  %v940_v27 = vpop.f32.mrb[39].mxu0  ;;  %v1299_v35 = vpop.f32.mrb[23].mxu1  ;;  %v1517_v50 = vand.u32 2147483647, %v1305_v34 }
 0x2e3   : > { %v1515_v19 = vand.u32 2147483647, %v1297_v51  ;;  %v1300_v36 = vadd.f32 %v1299_v35, %v2912_v22 }
 0x2e4   : > { %v1590_v29 = vadd.f32 %v1589_v14, %v1588_v61  ;;  %v1518_v43 = vand.u32 2147483647, %v1308_v26  ;;  %v1595_v12 = vsel %vm1567_vm1, %v1517_v50, 0.0 }
 0x2e5   : > { %v1591_v30 = vsel %vm1567_vm1, %v1515_v19, 0.0  ;;  %v1516_v40 = vand.u32 2147483647, %v1300_v36 }
 0x2e6   : > { %v1592_v42 = vadd.f32 %v1591_v30, %v1590_v29  ;;  %v1597_v56 = vsel %vm1567_vm1, %v1518_v43, 0.0 }
 0x2e7   : > { %v1593_v3 = vsel %vm1567_vm1, %v1516_v40, 0.0  ;;  %v2015_v41 = vpop.f32.mrb[24].mxu1 }
 0x2e8   : > { %v1594_v39 = vadd.f32 %v1593_v3, %v1592_v42  ;;  %v1321_v2 = vadd.f32 %v2015_v41, %v2916_v32  ;;  %v1312_v54 = vpop.f32.mrb[25].mxu1 }
 0x2e9   : > { %v1313_v52 = vadd.f32 %v1312_v54, %v2918_v37  ;;  %v2016_v62 = vpop.f32.mrb[26].mxu1 }
 0x2ea   : > { %v1596_v22 = vadd.f32 %v1595_v12, %v1594_v39  ;;  %v1324_v53 = vadd.f32 %v2016_v62, %v2921_v45  ;;  %v1315_v8 = vpop.f32.mrb[27].mxu1  ;;  %v1521_v18 = vand.u32 2147483647, %v1321_v2 }
 0x2eb   : > { %v1519_v57 = vand.u32 2147483647, %v1313_v52  ;;  %v1316_v59 = vadd.f32 %v1315_v8, %v2923_v49 }
 0x2ec   : > { %v1598_v6 = vadd.f32 %v1597_v56, %v1596_v22  ;;  %v1522_v21 = vand.u32 2147483647, %v1324_v53  ;;  %v1603_v44 = vsel %vm1567_vm1, %v1521_v18, 0.0 }
 0x2ed   : > { %v1599_v63 = vsel %vm1567_vm1, %v1519_v57, 0.0  ;;  %v1520_v32 = vand.u32 2147483647, %v1316_v59 }
 0x2ee   : > { %v1600_v1 = vadd.f32 %v1599_v63, %v1598_v6  ;;  %v1605_v13 = vsel %vm1567_vm1, %v1522_v21, 0.0 }
 0x2ef   : > { %v1601_v25 = vsel %vm1567_vm1, %v1520_v32, 0.0  ;;  %v1957_v37 = vpop.f32.mrb[40].mxu0  ;;  %v2019_v20 = vpop.f32.mrb[28].mxu1 }
 0x2f0   : > { %v1602_v38 = vadd.f32 %v1601_v25, %v1600_v1  ;;  %v1337_v33 = vadd.f32 %v2019_v20, %v1953_v23  ;;  %v953_v45 = vpop.f32.mrb[41].mxu0  ;;  %v1328_v31 = vpop.f32.mrb[29].mxu1 }
 0x2f1   : > { %v1329_v46 = vadd.f32 %v1328_v31, %v937_v55  ;;  %v1958_v4 = vpop.f32.mrb[42].mxu0  ;;  %v2020_v49 = vpop.f32.mrb[30].mxu1 }
 0x2f2   : > { %v1604_v5 = vadd.f32 %v1603_v44, %v1602_v38  ;;  %v1340_v7 = vadd.f32 %v2020_v49, %v1954_v17  ;;  %v956_v11 = vpop.f32.mrb[43].mxu0  ;;  %v1331_v60 = vpop.f32.mrb[31].mxu1  ;;  %v1525_v28 = vand.u32 2147483647, %v1337_v33 }
 0x2f3   : > { %v1523_v16 = vand.u32 2147483647, %v1329_v46  ;;  %v1332_v47 = vadd.f32 %v1331_v60, %v940_v27 }
 0x2f4   : > { %v1606_v58 = vadd.f32 %v1605_v13, %v1604_v5  ;;  %v1526_v48 = vand.u32 2147483647, %v1340_v7  ;;  %v1611_v17 = vsel %vm1567_vm1, %v1525_v28, 0.0 }
 0x2f5   : > { %v1607_v10 = vsel %vm1567_vm1, %v1523_v16, 0.0  ;;  %v1524_v23 = vand.u32 2147483647, %v1332_v47 }
 0x2f6   : > { %v1608_v24 = vadd.f32 %v1607_v10, %v1606_v58  ;;  %v1613_v14 = vsel %vm1567_vm1, %v1526_v48, 0.0 }
 0x2f7   : > { %v1609_v34 = vsel %vm1567_vm1, %v1524_v23, 0.0  ;;  %v2023_v55 = vpop.f32.mrb[32].mxu1 }
 0x2f8   : > { %v1610_v0 = vadd.f32 %v1609_v34, %v1608_v24  ;;  %v1353_v15 = vadd.f32 %v2023_v55, %v1957_v37  ;;  %v1344_v51 = vpop.f32.mrb[33].mxu1 }
 0x2f9   : > { %v1345_v9 = vadd.f32 %v1344_v51, %v953_v45  ;;  %v2024_v61 = vpop.f32.mrb[34].mxu1 }
 0x2fa   : > { %v1612_v26 = vadd.f32 %v1611_v17, %v1610_v0  ;;  %v1356_v35 = vadd.f32 %v2024_v61, %v1958_v4  ;;  %v1347_v27 = vpop.f32.mrb[35].mxu1  ;;  %v1529_v50 = vand.u32 2147483647, %v1353_v15 }
 0x2fb   : > { %v1527_v19 = vand.u32 2147483647, %v1345_v9  ;;  %v1348_v36 = vadd.f32 %v1347_v27, %v956_v11 }
 0x2fc   : > { %v1614_v29 = vadd.f32 %v1613_v14, %v1612_v26  ;;  %v1530_v43 = vand.u32 2147483647, %v1356_v35  ;;  %v1619_v62 = vsel %vm1567_vm1, %v1529_v50, 0.0 }
 0x2fd   : > { %v1615_v30 = vsel %vm1567_vm1, %v1527_v19, 0.0  ;;  %v1528_v40 = vand.u32 2147483647, %v1348_v36 }
 0x2fe   : > { %v1616_v42 = vadd.f32 %v1615_v30, %v1614_v29  ;;  %v1621_v18 = vsel %vm1567_vm1, %v1530_v43, 0.0 }
 0x2ff   : > { %v1617_v3 = vsel %vm1567_vm1, %v1528_v40, 0.0  ;;  %v1961_v41 = vpop.f32.mrb[44].mxu0  ;;  %v2027_v39 = vpop.f32.mrb[36].mxu1 }
 0x300   : > { %v1618_v2 = vadd.f32 %v1617_v3, %v1616_v42  ;;  %v1369_v54 = vadd.f32 %v2027_v39, %v1961_v41  ;;  %v969_v12 = vpop.f32.mrb[45].mxu0  ;;  %v1360_v52 = vpop.f32.mrb[37].mxu1 }
 0x301   : > { %v1361_v22 = vadd.f32 %v1360_v52, %v969_v12  ;;  %v1962_v53 = vpop.f32.mrb[46].mxu0  ;;  %v2028_v8 = vpop.f32.mrb[38].mxu1 }
 0x302   : > { %v1620_v56 = vadd.f32 %v1619_v62, %v1618_v2  ;;  %v1372_v57 = vadd.f32 %v2028_v8, %v1962_v53  ;;  %v972_v59 = vpop.f32.mrb[47].mxu0  ;;  %v1363_v6 = vpop.f32.mrb[39].mxu1  ;;  %v1533_v21 = vand.u32 2147483647, %v1369_v54 }
 0x303   : > { %v1531_v63 = vand.u32 2147483647, %v1361_v22  ;;  %v1364_v32 = vadd.f32 %v1363_v6, %v972_v59 }
 0x304   : > { %v1622_v1 = vadd.f32 %v1621_v18, %v1620_v56  ;;  %v1534_v38 = vand.u32 2147483647, %v1372_v57  ;;  %v1627_v5 = vsel %vm1567_vm1, %v1533_v21, 0.0 }
 0x305   : > { %v1623_v25 = vsel %vm1567_vm1, %v1531_v63, 0.0  ;;  %v1532_v37 = vand.u32 2147483647, %v1364_v32 }
 0x306   : > { %v1624_v20 = vadd.f32 %v1623_v25, %v1622_v1  ;;  %v1629_v28 = vsel %vm1567_vm1, %v1534_v38, 0.0 }
 0x307   : > { %v1625_v33 = vsel %vm1567_vm1, %v1532_v37, 0.0  ;;  %v1965_v45 = vpop.f32.mrb[48].mxu0  ;;  %v2031_v31 = vpop.f32.mrb[40].mxu1 }
 0x308   : > { %v1626_v44 = vadd.f32 %v1625_v33, %v1624_v20  ;;  %v1385_v46 = vadd.f32 %v2031_v31, %v1965_v45  ;;  %v985_v4 = vpop.f32.mrb[49].mxu0  ;;  %v1376_v49 = vpop.f32.mrb[41].mxu1 }
 0x309   : > { %v1377_v7 = vadd.f32 %v1376_v49, %v985_v4  ;;  %v1966_v11 = vpop.f32.mrb[50].mxu0  ;;  %v2032_v60 = vpop.f32.mrb[42].mxu1 }
 0x30a   : > { %v1628_v13 = vadd.f32 %v1627_v5, %v1626_v44  ;;  %v1388_v16 = vadd.f32 %v2032_v60, %v1966_v11  ;;  %v988_v47 = vpop.f32.mrb[51].mxu0  ;;  %v1379_v58 = vpop.f32.mrb[43].mxu1  ;;  %v1537_v48 = vand.u32 2147483647, %v1385_v46 }
 0x30b   : > { %v1535_v10 = vand.u32 2147483647, %v1377_v7  ;;  %v1380_v23 = vadd.f32 %v1379_v58, %v988_v47 }
 0x30c   : > { %v1630_v24 = vadd.f32 %v1629_v28, %v1628_v13  ;;  %v1538_v15 = vand.u32 2147483647, %v1388_v16  ;;  %v1635_v14 = vsel %vm1567_vm1, %v1537_v48, 0.0 }
 0x30d   : > { %v1631_v34 = vsel %vm1567_vm1, %v1535_v10, 0.0  ;;  %v1536_v55 = vand.u32 2147483647, %v1380_v23 }
 0x30e   : > { %v1632_v0 = vadd.f32 %v1631_v34, %v1630_v24  ;;  %v1637_v43 = vsel %vm1567_vm1, %v1538_v15, 0.0 }
 0x30f   : > { %v1633_v51 = vsel %vm1567_vm1, %v1536_v55, 0.0  ;;  %v1969_v17 = vpop.f32.mrb[52].mxu0  ;;  %v2035_v9 = vpop.f32.mrb[44].mxu1 }
 0x310   : > { %v1634_v61 = vadd.f32 %v1633_v51, %v1632_v0  ;;  %v1401_v26 = vadd.f32 %v2035_v9, %v1969_v17  ;;  %v1001_v35 = vpop.f32.mrb[53].mxu0  ;;  %v1392_v27 = vpop.f32.mrb[45].mxu1 }
 0x311   : > { %v1393_v19 = vadd.f32 %v1392_v27, %v1001_v35  ;;  %v1970_v36 = vpop.f32.mrb[54].mxu0  ;;  %v2036_v29 = vpop.f32.mrb[46].mxu1 }
 0x312   : > { %v1636_v50 = vadd.f32 %v1635_v14, %v1634_v61  ;;  %v1404_v30 = vadd.f32 %v2036_v29, %v1970_v36  ;;  %v1004_v40 = vpop.f32.mrb[55].mxu0  ;;  %v1395_v42 = vpop.f32.mrb[47].mxu1  ;;  %v1541_v2 = vand.u32 2147483647, %v1401_v26 }
 0x313   : > { %v1539_v3 = vand.u32 2147483647, %v1393_v19  ;;  %v1396_v41 = vadd.f32 %v1395_v42, %v1004_v40 }
 0x314   : > { %v1638_v39 = vadd.f32 %v1637_v43, %v1636_v50  ;;  %v1542_v62 = vand.u32 2147483647, %v1404_v30  ;;  %v1643_v18 = vsel %vm1567_vm1, %v1541_v2, 0.0 }
 0x315   : > { %v1639_v54 = vsel %vm1567_vm1, %v1539_v3, 0.0  ;;  %v1540_v12 = vand.u32 2147483647, %v1396_v41 }
 0x316   : > { %v1640_v52 = vadd.f32 %v1639_v54, %v1638_v39  ;;  %v1645_v38 = vsel %vm1567_vm1, %v1542_v62, 0.0 }
 0x317   : > { %v1641_v22 = vsel %vm1567_vm1, %v1540_v12, 0.0  ;;  %v1973_v53 = vpop.f32.mrb[56].mxu0  ;;  %v2039_v8 = vpop.f32.mrb[48].mxu1 }
 0x318   : > { %v1642_v56 = vadd.f32 %v1641_v22, %v1640_v52  ;;  %v1417_v57 = vadd.f32 %v2039_v8, %v1973_v53  ;;  %v1017_v59 = vpop.f32.mrb[57].mxu0  ;;  %v1408_v6 = vpop.f32.mrb[49].mxu1 }
 0x319   : > { %v1409_v63 = vadd.f32 %v1408_v6, %v1017_v59  ;;  %v1974_v32 = vpop.f32.mrb[58].mxu0  ;;  %v2040_v1 = vpop.f32.mrb[50].mxu1 }
 0x31a   : > { %v1644_v21 = vadd.f32 %v1643_v18, %v1642_v56  ;;  %v1420_v25 = vadd.f32 %v2040_v1, %v1974_v32  ;;  %v1020_v37 = vpop.f32.mrb[59].mxu0  ;;  %v1411_v20 = vpop.f32.mrb[51].mxu1  ;;  %v1545_v44 = vand.u32 2147483647, %v1417_v57 }
 0x31b   : > { %v1543_v33 = vand.u32 2147483647, %v1409_v63  ;;  %v1412_v45 = vadd.f32 %v1411_v20, %v1020_v37 }
 0x31c   : > { %v1646_v31 = vadd.f32 %v1645_v38, %v1644_v21  ;;  %v1546_v5 = vand.u32 2147483647, %v1420_v25  ;;  %v1651_v28 = vsel %vm1567_vm1, %v1545_v44, 0.0 }
 0x31d   : > { %v1647_v46 = vsel %vm1567_vm1, %v1543_v33, 0.0  ;;  %v1544_v4 = vand.u32 2147483647, %v1412_v45 }
 0x31e   : > { %v1648_v49 = vadd.f32 %v1647_v46, %v1646_v31  ;;  %v1653_v15 = vsel %vm1567_vm1, %v1546_v5, 0.0 }
 0x31f   : > { %v1649_v7 = vsel %vm1567_vm1, %v1544_v4, 0.0  ;;  %v1977_v11 = vpop.f32.mrb[60].mxu0  ;;  %v2043_v60 = vpop.f32.mrb[52].mxu1 }
 0x320   : > { %v1650_v13 = vadd.f32 %v1649_v7, %v1648_v49  ;;  %v1433_v16 = vadd.f32 %v2043_v60, %v1977_v11  ;;  %v1033_v47 = vpop.f32.mrb[61].mxu0  ;;  %v1424_v58 = vpop.f32.mrb[53].mxu1 }
 0x321   : > { %v1425_v10 = vadd.f32 %v1424_v58, %v1033_v47  ;;  %v1978_v23 = vpop.f32.mrb[62].mxu0  ;;  %v2044_v24 = vpop.f32.mrb[54].mxu1 }
 0x322   : > { %v1652_v48 = vadd.f32 %v1651_v28, %v1650_v13  ;;  %v1436_v34 = vadd.f32 %v2044_v24, %v1978_v23  ;;  %v1036_v55 = vpop.f32.mrb[63].mxu0  ;;  %v1427_v0 = vpop.f32.mrb[55].mxu1  ;;  %v1549_v61 = vand.u32 2147483647, %v1433_v16 }
 0x323   : > { %v1547_v51 = vand.u32 2147483647, %v1425_v10  ;;  %v1428_v17 = vadd.f32 %v1427_v0, %v1036_v55 }
 0x324   : > { %v1654_v9 = vadd.f32 %v1653_v15, %v1652_v48  ;;  %v1550_v14 = vand.u32 2147483647, %v1436_v34  ;;  %v1659_v43 = vsel %vm1567_vm1, %v1549_v61, 0.0 }
 0x325   : > { %v1655_v26 = vsel %vm1567_vm1, %v1547_v51, 0.0  ;;  %v1548_v35 = vand.u32 2147483647, %v1428_v17 }
 0x326   : > { %v1656_v27 = vadd.f32 %v1655_v26, %v1654_v9  ;;  %v1661_v62 = vsel %vm1567_vm1, %v1550_v14, 0.0 }
 0x327   : > { %v1657_v19 = vsel %vm1567_vm1, %v1548_v35, 0.0  ;;  %v1981_v36 = vpop.f32.mrb[64].mxu0  ;;  %v2047_v29 = vpop.f32.mrb[56].mxu1 }
 0x328   : > { %v1658_v50 = vadd.f32 %v1657_v19, %v1656_v27  ;;  %v1449_v30 = vadd.f32 %v2047_v29, %v1981_v36  ;;  %v1049_v40 = vpop.f32.mrb[65].mxu0  ;;  %v1440_v42 = vpop.f32.mrb[57].mxu1 }
 0x329   : > { %v1441_v3 = vadd.f32 %v1440_v42, %v1049_v40  ;;  %v1982_v41 = vpop.f32.mrb[66].mxu0  ;;  %v2048_v39 = vpop.f32.mrb[58].mxu1 }
 0x32a   : > { %v1660_v2 = vadd.f32 %v1659_v43, %v1658_v50  ;;  %v1452_v54 = vadd.f32 %v2048_v39, %v1982_v41  ;;  %v1052_v12 = vpop.f32.mrb[67].mxu0  ;;  %v1443_v52 = vpop.f32.mrb[59].mxu1  ;;  %v1553_v56 = vand.u32 2147483647, %v1449_v30 }
 0x32b   : > { %v1551_v22 = vand.u32 2147483647, %v1441_v3  ;;  %v1444_v53 = vadd.f32 %v1443_v52, %v1052_v12 }
 0x32c   : > { %v1662_v8 = vadd.f32 %v1661_v62, %v1660_v2  ;;  %v1554_v18 = vand.u32 2147483647, %v1452_v54  ;;  %v1667_v38 = vsel %vm1567_vm1, %v1553_v56, 0.0 }
 0x32d   : > { %v1663_v57 = vsel %vm1567_vm1, %v1551_v22, 0.0  ;;  %v1552_v59 = vand.u32 2147483647, %v1444_v53 }
 0x32e   : > { %v1664_v6 = vadd.f32 %v1663_v57, %v1662_v8  ;;  %v1669_v5 = vsel %vm1567_vm1, %v1554_v18, 0.0 }
 0x32f   : > { %v1665_v63 = vsel %vm1567_vm1, %v1552_v59, 0.0  ;;  %v1985_v32 = vpop.f32.mrb[68].mxu0  ;;  %v2051_v1 = vpop.f32.mrb[60].mxu1 }
 0x330   : > { %v1666_v21 = vadd.f32 %v1665_v63, %v1664_v6  ;;  %v1465_v25 = vadd.f32 %v2051_v1, %v1985_v32  ;;  %v1065_v37 = vpop.f32.mrb[69].mxu0  ;;  %v1456_v20 = vpop.f32.mrb[61].mxu1 }
 0x331   : > { %v1457_v33 = vadd.f32 %v1456_v20, %v1065_v37  ;;  %v1986_v45 = vpop.f32.mrb[70].mxu0  ;;  %v2052_v31 = vpop.f32.mrb[62].mxu1 }
 0x332   : > { %v1668_v44 = vadd.f32 %v1667_v38, %v1666_v21  ;;  %v1468_v46 = vadd.f32 %v2052_v31, %v1986_v45  ;;  %v1068_v4 = vpop.f32.mrb[71].mxu0  ;;  %v1459_v49 = vpop.f32.mrb[63].mxu1  ;;  %v1557_v13 = vand.u32 2147483647, %v1465_v25 }
 0x333   : > { %v1555_v7 = vand.u32 2147483647, %v1457_v33  ;;  %v1460_v11 = vadd.f32 %v1459_v49, %v1068_v4 }
 0x334   : > { %v1670_v60 = vadd.f32 %v1669_v5, %v1668_v44  ;;  %v1558_v28 = vand.u32 2147483647, %v1468_v46  ;;  %v1675_v34 = vsel %vm1567_vm1, %v1557_v13, 0.0 }
 0x335   : > { %v1671_v16 = vsel %vm1567_vm1, %v1555_v7, 0.0  ;;  %v1556_v47 = vand.u32 2147483647, %v1460_v11 }
 0x336   : > { %v1672_v58 = vadd.f32 %v1671_v16, %v1670_v60  ;;  %v1677_v17 = vsel %vm1567_vm1, %v1558_v28, 0.0 }
 0x337   : > { %v1673_v10 = vsel %vm1567_vm1, %v1556_v47, 0.0  ;;  %v2055_v23 = vpop.f32.mrb[0].mxu1 }
 0x338   : > { %v1674_v24 = vadd.f32 %v1673_v10, %v1672_v58  ;;  %v1472_v48 = vpop.f32.mrb[1].mxu1  ;;  %v1561_v26 = vand.u32 2147483647, %v2055_v23 }
 0x339   : > { %v1559_v55 = vand.u32 2147483647, %v1472_v48  ;;  %v2056_v0 = vpop.f32.mrb[2].mxu1 }
 0x33a   : > { %v1676_v15 = vadd.f32 %v1675_v34, %v1674_v24  ;;  %v1475_v51 = vpop.f32.mrb[3].mxu1  ;;  %v1562_v14 = vand.u32 2147483647, %v2056_v0  ;;  %v1683_v30 = vsel %vm1567_vm1, %v1561_v26, 0.0 }
 0x33b   : > { %v1560_v9 = vand.u32 2147483647, %v1475_v51  ;;  %v1679_v35 = vsel %vm1567_vm1, %v1559_v55, 0.0 }
 0x33c   : > { %v1678_v61 = vadd.f32 %v1677_v17, %v1676_v15  ;;  %v1685_v41 = vsel %vm1567_vm1, %v1562_v14, 0.0 }
 0x33d   : > { %v1681_v19 = vsel %vm1567_vm1, %v1560_v9, 0.0 }
 0x33e   : > { %v1680_v27 = vadd.f32 %v1679_v35, %v1678_v61 }
 0x33f   : > { %v2059_v36 = vpop.f32.mrb[4].mxu1 }
 0x340   : > { %v1682_v29 = vadd.f32 %v1681_v19, %v1680_v27  ;;  %v1488_v50 = vpop.f32.mrb[5].mxu1  ;;  %v1565_v54 = vand.u32 2147483647, %v2059_v36 }
 0x341   : > { %v1563_v40 = vand.u32 2147483647, %v1488_v50  ;;  %v2060_v42 = vpop.f32.mrb[6].mxu1 }
 0x342   : > { %v1684_v43 = vadd.f32 %v1683_v30, %v1682_v29  ;;  %v1491_v3 = vpop.f32.mrb[7].mxu1  ;;  %v1566_v62 = vand.u32 2147483647, %v2060_v42  ;;  %v1691_v8 = vsel %vm1567_vm1, %v1565_v54, 0.0 }
 0x343   : > { %v1564_v39 = vand.u32 2147483647, %v1491_v3  ;;  %v1687_v12 = vsel %vm1567_vm1, %v1563_v40, 0.0 }
 0x344   : > { %v1686_v2 = vadd.f32 %v1685_v41, %v1684_v43  ;;  %v1693_v57 = vsel %vm1567_vm1, %v1566_v62, 0.0 }
 0x345   : > { %v1689_v22 = vsel %vm1567_vm1, %v1564_v39, 0.0 }
 0x346   : > { %v1688_v52 = vadd.f32 %v1687_v12, %v1686_v2 }
 0x348   : > { %v1690_v53 = vadd.f32 %v1689_v22, %v1688_v52 }
 0x34a   : > { %v1692_v56 = vadd.f32 %v1691_v8, %v1690_v53 }
 0x34c   : > { %v1694_v59 = vadd.f32 %v1693_v57, %v1692_v56 }
 0x34e   : > { %1695 = vst.msk [vmem:[%s269_s7] sm:$0xff] %vm1567_vm1, %v1694_v59 }
 0x34f PF: > { %p15_p9 = scmp.ge.s32.totalorder %s2549_s23, 4   ;;  %s3022_s18 = smov %s2483_s19 }
 0x350   : > { %s3023_s19 = smov %s2487_s20  ;;  %s3024_s20 = smov %s2559_s26 }
 0x351   : > { %s3025_s21 = smov %s2549_s23  ;;  %17 = sbr.rel (!%p15_p9) target bundleno = 3 (0x3), region = 83 }
 0x358   :  { %1715 = vsyncpa [#allocation3], 1 }
 0x359   :  { %1717 = vsyncpa [#allocation3 + $0x1], 1 }

</bundles_post_ra>
